<compile_context>
chip_gen: v7x
topology: tpu7x:2x2x1
jax: 0.10.0
libtpu: 0.0.40
codegen_flags: <defaults>
</compile_context>

<pallas_src>
import functools

import jax
import jax.numpy as jnp
from jax.experimental import pallas as pl
from jax.experimental.pallas import tpu as pltpu


def _pdist_mean_kernel(i_idx_ref, j_idx_ref, row_ref, colt_ref, out_ref, *,
                       n, n_pad, tile, use_gram, gram_bf16):
    s = pl.program_id(0)
    ii = i_idx_ref[s]
    jj = j_idx_ref[s]

    xr = row_ref[...].astype(jnp.float32)     # (tm, D): points on sublanes
    xct = colt_ref[...].astype(jnp.float32)   # (D, tn): points on lanes
    tm, feat = xr.shape
    tn = xct.shape[1]

    if use_gram:
        # Larger-D path: MXU Gram matrix + VPU squared norms.
        if gram_bf16:
            g = jnp.dot(xr.astype(jnp.bfloat16), xct.astype(jnp.bfloat16),
                        preferred_element_type=jnp.float32)
        else:
            g = jnp.dot(xr, xct, preferred_element_type=jnp.float32)
        rs = jnp.sum(xr * xr, axis=1, keepdims=True)                # (tm, 1)
        cs = jnp.sum(xct * xct, axis=0, keepdims=True)              # (1, tn)
        sq = jnp.maximum(rs + cs - 2.0 * g, 0.0)
    else:
        # Small-D path: explicit coordinate differences on the VPU.
        sq = jnp.zeros((tm, tn), jnp.float32)
        for k in range(feat):                   # static unroll, D is small
            diff = xr[:, k:k + 1] - xct[k:k + 1, :]
            sq = sq + diff * diff

    # Padding mask, separable and applied BEFORE the sqrt (sqrt(0) == 0):
    # two cheap multiplies per element instead of iota planes + select.
    if n_pad != n:
        row_keep = (ii * tile + jax.lax.broadcasted_iota(jnp.int32, (tm, 1), 0)
                    < n).astype(jnp.float32)
        col_keep = (jj * tile + jax.lax.broadcasted_iota(jnp.int32, (1, tn), 1)
                    < n).astype(jnp.float32)
        sq = sq * row_keep * col_keep

    if use_gram:
        # The Gram form's self-distances are only approximately zero due to
        # cancellation; zero them explicitly.  Self-pairs only occur on
        # diagonal tiles (tm == tn == tile).
        lr = jax.lax.broadcasted_iota(jnp.int32, (tm, tn), 0)
        lc = jax.lax.broadcasted_iota(jnp.int32, (tm, tn), 1)
        nondiag = jnp.logical_or(lr != lc, ii != jj)
        sq = jnp.where(nondiag, sq, 0.0)

    dist = jnp.sqrt(sq)   # diff-form diagonal is exactly zero

    # Off-diagonal tile pair (ii < jj): every unordered pair appears once.
    # Diagonal tile (ii == jj): symmetric with zero diagonal -> weight 0.5.
    weight = jnp.where(ii == jj, jnp.float32(0.5), jnp.float32(1.0))
    out_ref[s] = weight * jnp.sum(dist)


def mean_pairwise_distances(pos: jax.Array, *, tile: int = 1024,
                            gram_bf16: bool = True) -> jax.Array:
    """Pallas equivalent of MeanPairwiseDistances().forward() == F.pdist(pos).mean()."""
    n, d = pos.shape
    if n < 2:
        # torch: pdist of <2 points is empty; mean of an empty tensor is NaN.
        return jnp.float32(jnp.nan)

    if tile >= n:
        tile = n                                   # single block, no padding
        n_pad = n
    else:
        tile = max(128, (tile // 128) * 128)       # lane-aligned column tiles
        n_pad = pl.cdiv(n, tile) * tile

    pos_pad = pos if n_pad == n else jnp.pad(pos, ((0, n_pad - n), (0, 0)))
    pos_t = pos_pad.T                              # (D, N_pad), transposed once by XLA

    grid_n = n_pad // tile
    count = n * (n - 1) / 2.0

    # Upper-triangle tile pairs, i-major so the row tile stays resident.
    pairs = [(i, j) for i in range(grid_n) for j in range(i, grid_n)]
    num_steps = len(pairs)
    i_idx = jnp.asarray([p[0] for p in pairs], dtype=jnp.int32)
    j_idx = jnp.asarray([p[1] for p in pairs], dtype=jnp.int32)

    kernel = functools.partial(
        _pdist_mean_kernel,
        n=n, n_pad=n_pad, tile=tile,
        use_gram=(d >= 16),        # tiny D -> VPU diff form; D >= 16 -> MXU Gram
        gram_bf16=gram_bf16,       # bf16 Gram: ~4x MXU rate on v6e/v7x, looser tol
    )

    grid_spec = pltpu.PrefetchScalarGridSpec(
        num_scalar_prefetch=2,
        grid=(num_steps,),
        in_specs=[
            pl.BlockSpec((tile, d), lambda s, ii, jj: (ii[s], 0)),   # row tile (tm, D)
            pl.BlockSpec((d, tile), lambda s, ii, jj: (0, jj[s])),   # col tile (D, tn)
        ],
        out_specs=pl.BlockSpec(memory_space=pltpu.SMEM),             # per-step partials
    )

    partials = pl.pallas_call(
        kernel,
        out_shape=jax.ShapeDtypeStruct((num_steps,), jnp.float32),
        grid_spec=grid_spec,
        compiler_params=pltpu.CompilerParams(
            # Single triangular axis reduces into the resident SMEM output.
            dimension_semantics=("arbitrary",),
            vmem_limit_bytes=48 * 1024 * 1024,
        ),
    )(i_idx, j_idx, pos_pad, pos_t)

    return jnp.sum(partials) * jnp.float32(1.0 / count)


def _reference(pos: jax.Array) -> jax.Array:
    # Pure-JAX reference of F.pdist(pos).mean().
    n = pos.shape[0]
    diff = pos[:, None, :] - pos[None, :, :]
    dist = jnp.sqrt(jnp.sum(diff * diff, axis=-1))
    row = jnp.arange(n)[:, None]
    col = jnp.arange(n)[None, :]
    mask = row < col
    return jnp.sum(jnp.where(mask, dist, 0.0)) / (n * (n - 1) / 2.0)


if __name__ == "__main__":
    key = jax.random.PRNGKey(0)
    k1, k2, k3 = jax.random.split(key, 3)

    # Module-implied small shape: N points with D coordinates (diff path).
    N, D = 16, 8
    pos = jax.random.normal(k1, (N, D), dtype=jnp.float32)
    result = jax.block_until_ready(mean_pairwise_distances(pos))
    ref = jax.block_until_ready(_reference(pos))
    assert jnp.allclose(result, ref, rtol=1e-5, atol=1e-5), (result, ref)

    # Tiled + padded triangular multi-step path (N not a tile multiple).
    pos2 = jax.random.normal(k2, (200, D), dtype=jnp.float32)
    result2 = jax.block_until_ready(mean_pairwise_distances(pos2, tile=128))
    ref2 = jax.block_until_ready(_reference(pos2))
    assert jnp.allclose(result2, ref2, rtol=1e-4, atol=1e-4), (result2, ref2)

    # Gram/MXU path (D >= 16), tiled + padded, f32 contraction for tight tol.
    pos3 = jax.random.normal(k3, (200, 24), dtype=jnp.float32)
    result3 = jax.block_until_ready(
        mean_pairwise_distances(pos3, tile=128, gram_bf16=False))
    ref3 = jax.block_until_ready(_reference(pos3))
    assert jnp.allclose(result3, ref3, rtol=1e-3, atol=1e-3), (result3, ref3)

    print("KERNEL_OK")
</pallas_src>

<mosaic_0001>
module attributes {stable_mosaic.version = 11 : i64} {
  func.func @_pdist_mean_kernel(%arg0: i32, %arg1: memref<1xi32, #tpu.memory_space<smem>>, %arg2: memref<1xi32, #tpu.memory_space<smem>>, %arg3: memref<16x8xf32, #tpu.memory_space<vmem>>, %arg4: memref<8x16xf32, #tpu.memory_space<vmem>>, %arg5: memref<1xf32, #tpu.memory_space<smem>>) attributes {dimension_semantics = [#tpu.dimension_semantics<arbitrary>], iteration_bounds = array<i64: 1>, scalar_prefetch = 2 : i64, scratch_operands = 0 : i64, tpu.core_type = #tpu.core_type<tc>, window_params = [{transform_indices = @transform_0, window_bounds = array<i64: 16, 8>}, {transform_indices = @transform_1, window_bounds = array<i64: 8, 16>}, {transform_indices = @transform_2, window_bounds = array<i64: 1>}]} {
    %0 = arith.index_cast %arg0 : i32 to index
    %1 = memref.load %arg1[%0] : memref<1xi32, #tpu.memory_space<smem>>
    %2 = arith.index_cast %arg0 : i32 to index
    %3 = memref.load %arg2[%2] : memref<1xi32, #tpu.memory_space<smem>>
    %c0 = arith.constant 0 : index
    %c0_0 = arith.constant 0 : index
    %4 = vector.load %arg3[%c0, %c0_0] : memref<16x8xf32, #tpu.memory_space<vmem>>, vector<16x8xf32>
    %c0_1 = arith.constant 0 : index
    %c0_2 = arith.constant 0 : index
    %5 = vector.load %arg4[%c0_1, %c0_2] : memref<8x16xf32, #tpu.memory_space<vmem>>, vector<8x16xf32>
    %cst = arith.constant 0.000000e+00 : f32
    %6 = vector.broadcast %cst : f32 to vector<16x16xf32>
    %7 = vector.extract_strided_slice %4 {offsets = [0, 0], sizes = [16, 1], strides = [1, 1]} : vector<16x8xf32> to vector<16x1xf32>
    %8 = vector.extract_strided_slice %5 {offsets = [0, 0], sizes = [1, 16], strides = [1, 1]} : vector<8x16xf32> to vector<1x16xf32>
    %9 = vector.broadcast %7 : vector<16x1xf32> to vector<16x16xf32>
    %10 = vector.broadcast %8 : vector<1x16xf32> to vector<16x16xf32>
    %11 = arith.subf %9, %10 : vector<16x16xf32>
    %12 = arith.mulf %11, %11 : vector<16x16xf32>
    %13 = arith.addf %6, %12 : vector<16x16xf32>
    %14 = vector.extract_strided_slice %4 {offsets = [0, 1], sizes = [16, 1], strides = [1, 1]} : vector<16x8xf32> to vector<16x1xf32>
    %15 = vector.extract_strided_slice %5 {offsets = [1, 0], sizes = [1, 16], strides = [1, 1]} : vector<8x16xf32> to vector<1x16xf32>
    %16 = vector.broadcast %14 : vector<16x1xf32> to vector<16x16xf32>
    %17 = vector.broadcast %15 : vector<1x16xf32> to vector<16x16xf32>
    %18 = arith.subf %16, %17 : vector<16x16xf32>
    %19 = arith.mulf %18, %18 : vector<16x16xf32>
    %20 = arith.addf %13, %19 : vector<16x16xf32>
    %21 = vector.extract_strided_slice %4 {offsets = [0, 2], sizes = [16, 1], strides = [1, 1]} : vector<16x8xf32> to vector<16x1xf32>
    %22 = vector.extract_strided_slice %5 {offsets = [2, 0], sizes = [1, 16], strides = [1, 1]} : vector<8x16xf32> to vector<1x16xf32>
    %23 = vector.broadcast %21 : vector<16x1xf32> to vector<16x16xf32>
    %24 = vector.broadcast %22 : vector<1x16xf32> to vector<16x16xf32>
    %25 = arith.subf %23, %24 : vector<16x16xf32>
    %26 = arith.mulf %25, %25 : vector<16x16xf32>
    %27 = arith.addf %20, %26 : vector<16x16xf32>
    %28 = vector.extract_strided_slice %4 {offsets = [0, 3], sizes = [16, 1], strides = [1, 1]} : vector<16x8xf32> to vector<16x1xf32>
    %29 = vector.extract_strided_slice %5 {offsets = [3, 0], sizes = [1, 16], strides = [1, 1]} : vector<8x16xf32> to vector<1x16xf32>
    %30 = vector.broadcast %28 : vector<16x1xf32> to vector<16x16xf32>
    %31 = vector.broadcast %29 : vector<1x16xf32> to vector<16x16xf32>
    %32 = arith.subf %30, %31 : vector<16x16xf32>
    %33 = arith.mulf %32, %32 : vector<16x16xf32>
    %34 = arith.addf %27, %33 : vector<16x16xf32>
    %35 = vector.extract_strided_slice %4 {offsets = [0, 4], sizes = [16, 1], strides = [1, 1]} : vector<16x8xf32> to vector<16x1xf32>
    %36 = vector.extract_strided_slice %5 {offsets = [4, 0], sizes = [1, 16], strides = [1, 1]} : vector<8x16xf32> to vector<1x16xf32>
    %37 = vector.broadcast %35 : vector<16x1xf32> to vector<16x16xf32>
    %38 = vector.broadcast %36 : vector<1x16xf32> to vector<16x16xf32>
    %39 = arith.subf %37, %38 : vector<16x16xf32>
    %40 = arith.mulf %39, %39 : vector<16x16xf32>
    %41 = arith.addf %34, %40 : vector<16x16xf32>
    %42 = vector.extract_strided_slice %4 {offsets = [0, 5], sizes = [16, 1], strides = [1, 1]} : vector<16x8xf32> to vector<16x1xf32>
    %43 = vector.extract_strided_slice %5 {offsets = [5, 0], sizes = [1, 16], strides = [1, 1]} : vector<8x16xf32> to vector<1x16xf32>
    %44 = vector.broadcast %42 : vector<16x1xf32> to vector<16x16xf32>
    %45 = vector.broadcast %43 : vector<1x16xf32> to vector<16x16xf32>
    %46 = arith.subf %44, %45 : vector<16x16xf32>
    %47 = arith.mulf %46, %46 : vector<16x16xf32>
    %48 = arith.addf %41, %47 : vector<16x16xf32>
    %49 = vector.extract_strided_slice %4 {offsets = [0, 6], sizes = [16, 1], strides = [1, 1]} : vector<16x8xf32> to vector<16x1xf32>
    %50 = vector.extract_strided_slice %5 {offsets = [6, 0], sizes = [1, 16], strides = [1, 1]} : vector<8x16xf32> to vector<1x16xf32>
    %51 = vector.broadcast %49 : vector<16x1xf32> to vector<16x16xf32>
    %52 = vector.broadcast %50 : vector<1x16xf32> to vector<16x16xf32>
    %53 = arith.subf %51, %52 : vector<16x16xf32>
    %54 = arith.mulf %53, %53 : vector<16x16xf32>
    %55 = arith.addf %48, %54 : vector<16x16xf32>
    %56 = vector.extract_strided_slice %4 {offsets = [0, 7], sizes = [16, 1], strides = [1, 1]} : vector<16x8xf32> to vector<16x1xf32>
    %57 = vector.extract_strided_slice %5 {offsets = [7, 0], sizes = [1, 16], strides = [1, 1]} : vector<8x16xf32> to vector<1x16xf32>
    %58 = vector.broadcast %56 : vector<16x1xf32> to vector<16x16xf32>
    %59 = vector.broadcast %57 : vector<1x16xf32> to vector<16x16xf32>
    %60 = arith.subf %58, %59 : vector<16x16xf32>
    %61 = arith.mulf %60, %60 : vector<16x16xf32>
    %62 = arith.addf %55, %61 : vector<16x16xf32>
    %63 = math.sqrt %62 : vector<16x16xf32>
    %64 = arith.cmpi eq, %1, %3 : i32
    %cst_3 = arith.constant 5.000000e-01 : f32
    %cst_4 = arith.constant 1.000000e+00 : f32
    %65 = arith.select %64, %cst_3, %cst_4 : f32
    %66 = vector.shape_cast %63 : vector<16x16xf32> to vector<1x16x16xf32>
    %cst_5 = arith.constant dense<0.000000e+00> : vector<1xf32>
    %67 = vector.multi_reduction <add>, %66, %cst_5 [1, 2] : vector<1x16x16xf32> to vector<1xf32>
    %68 = vector.shape_cast %67 : vector<1xf32> to vector<1x1x1xf32>
    %69 = vector.extract %68[0, 0, 0] : f32 from vector<1x1x1xf32>
    %70 = arith.mulf %65, %69 : f32
    %71 = arith.index_cast %arg0 : i32 to index
    %72 = memref.load %arg5[%71] : memref<1xf32, #tpu.memory_space<smem>>
    memref.store %70, %arg5[%71] : memref<1xf32, #tpu.memory_space<smem>>
    return
  }
  func.func @transform_0(%arg0: i32, %arg1: memref<1xi32, #tpu.memory_space<smem>>, %arg2: memref<1xi32, #tpu.memory_space<smem>>) -> (i32, i32) {
    %0 = arith.index_cast %arg0 : i32 to index
    %1 = memref.load %arg1[%0] : memref<1xi32, #tpu.memory_space<smem>>
    %c0_i32 = arith.constant 0 : i32
    %c0_i32_0 = arith.constant 0 : i32
    return %1, %c0_i32 : i32, i32
  }
  func.func @transform_1(%arg0: i32, %arg1: memref<1xi32, #tpu.memory_space<smem>>, %arg2: memref<1xi32, #tpu.memory_space<smem>>) -> (i32, i32) {
    %0 = arith.index_cast %arg0 : i32 to index
    %1 = memref.load %arg2[%0] : memref<1xi32, #tpu.memory_space<smem>>
    %c0_i32 = arith.constant 0 : i32
    %c0_i32_0 = arith.constant 0 : i32
    return %c0_i32, %1 : i32, i32
  }
  func.func @transform_2(%arg0: i32, %arg1: memref<1xi32, #tpu.memory_space<smem>>, %arg2: memref<1xi32, #tpu.memory_space<smem>>) -> i32 {
    %c0_i32 = arith.constant 0 : i32
    %c0_i32_0 = arith.constant 0 : i32
    return %c0_i32 : i32
  }
}

</mosaic_0001>

<bundles_post_ra>
// kernel: tpu_custom_call.1
= control target key start
LH: loop header
LB: loop body
LE: loop exit
PB: predicated region body
PF: predicated region fallthrough
CT: control target
= control target key end

     0   :  { %v306_v0 = vmov 1   ;;  %v307_v1 = vmov 0   ;;  %s373_s0 = inlined_call_operand.<no memory space> [shape: s32[1], index: 0, kind: input, shape index: {}]   ;;  %s374_s1 = inlined_call_operand.<no memory space> [shape: s32[1], index: 1, kind: input, shape index: {}]   ;;  %s375_s2 = inlined_call_operand.vmem [shape: f32[16,8], index: 2, kind: input, shape index: {}]   ;;  %s376_s3 = inlined_call_operand.vmem [shape: f32[8,16], index: 3, kind: input, shape index: {}]   ;;  %s377_s4 = inlined_call_operand.hbm [shape: f32[1], index: 4, kind: output, shape index: {}]  }
   0x1   :  { %s263_s17 = sshll.u32 %s373_s0, 1  ;;  %278 = vset.pattern.permute.xlu1 %v306_v0  ;;  %277 = vset.pattern.permute.xlu0 %v307_v1 }
   0x2   :  { %p43_p0 = scmp.lt.s32.totalorder %s263_s17, 1 }
   0x3   :  { %11 = vsyncpa [#allocation6], 0  ;;  %v308_v4 = vmov 2   ;;  %v309_v5 = vmov 3   ;;  %v310_v6 = vmov 4   ;;  %v311_v7 = vmov 5   ;;  %p220_p2 = scmp.eq.s32.totalorder %s373_s0, %s374_s1 }
   0x4   :  { %s379_s17 = smov (!%p43_p0, %s263_s17), 1  ;;  %v312_v8 = vmov 6   ;;  %v313_v9 = vmov 7   ;;  %p50_p1 = scmp.lt.s32.totalorder %s374_s1, 0  ;;  %v70_v11 = vlaneseq  ;;  %vm222_vm3 = vcmask 130048  }
   0x5   :  { %s264_s18 = sshll.u32 %s379_s17, 3  ;;  %s294_s12 = scalar_lea.hbm %s377_s4, 16 }
   0x6   :  { %s46_s21 = scalar_lea.vmem %s375_s2, %s264_s18  ;;  %v71_v14 = vshrl.u32 %v70_v11, 7  ;;  %p295_p3 = scmp.ne.s32.totalorder %s377_s4, %s294_s12 }
   0x7   :  { %v57_v2 = vld [vmem:[%s46_s21] sm:$0xff]  ;;  %v58_v3 = vld [vmem:[%s46_s21 + $0x8] sm:$0xff]  ;;  %s51_s25 = scalar_select %p50_p1, %s374_s1, 0 }
   0x8   :  { %81 = vperm.xlu1 %278, %v57_v2   ;;  %62 = vperm.xlu0 %277, %v57_v2   ;;  %v90_v16 = vsub.s32 1, %v71_v14  ;;  %v72_v17 = vsub.s32 0, %v71_v14  ;;  %v108_v21 = vsub.s32 2, %v71_v14  ;;  %v126_v24 = vsub.s32 3, %v71_v14  ;;  %s221_s7 = scalar_select %p220_p2, 0.5, 1.0 }
   0x9   :  { %s265_s26 = sshll.u32 %s51_s25, 3  ;;  %v144_v27 = vsub.s32 4, %v71_v14  ;;  %v162_v34 = vsub.s32 5, %v71_v14  ;;  %v180_v49 = vsub.s32 6, %v71_v14  ;;  %v198_v55 = vsub.s32 7, %v71_v14  ;;  %p298_p4 = scmp.lt.u32.totalorder %s294_s12, %s377_s4 }
   0xa   :  { %s53_s29 = scalar_lea.vmem %s376_s3, %s265_s26 }
   0xb   :  { %v59_v19 = vld [vmem:[%s53_s29] sm:$0xff]  ;;  %p300_p5 = pnand %p298_p4, %p295_p3 }
   0xc   :  { %85 = vperm.xlu1 %278, %v58_v3   ;;  %67 = vperm.xlu0 %277, %v58_v3   ;;  %v91_v22 = vrot.slane %v59_v19, %v90_v16  ;;  %v73_v23 = vrot.slane %v59_v19, %v72_v17  ;;  %v109_v26 = vrot.slane %v59_v19, %v108_v21 }
   0xd   :  { %v127_v31 = vrot.slane %v59_v19, %v126_v24  ;;  %v145_v33 = vrot.slane %v59_v19, %v144_v27  ;;  %v163_v45 = vrot.slane %v59_v19, %v162_v34  ;;  %v181_v60 = vrot.slane %v59_v19, %v180_v49 }
  0x10   :  { %280 = vset.pattern.permute.xlu1 %v308_v4  ;;  %279 = vset.pattern.permute.xlu0 %v308_v4  ;;  %v199_v4 = vrot.slane %v59_v19, %v198_v55 }
  0x11   :  { %103 = vperm.xlu1 %280, %v58_v3   ;;  %99 = vperm.xlu0 %279, %v57_v2  }
  0x15   :  { %281 = vset.pattern.permute.xlu1 %v309_v5  ;;  %282 = vset.pattern.permute.xlu0 %v309_v5 }
  0x16   :  { %117 = vperm.xlu1 %281, %v57_v2   ;;  %121 = vperm.xlu0 %282, %v58_v3  }
  0x1a   :  { %283 = vset.pattern.permute.xlu1 %v310_v6  ;;  %284 = vset.pattern.permute.xlu0 %v311_v7 }
  0x1b   :  { %135 = vperm.xlu1 %283, %v57_v2   ;;  %153 = vperm.xlu0 %284, %v57_v2  }
  0x1f   :  { %139 = vperm.xlu1 %283, %v58_v3   ;;  %287 = vset.pattern.permute.xlu0 %v312_v8 }
  0x20   :  { %175 = vperm.xlu0 %287, %v58_v3  }
  0x23   :  { %285 = vset.pattern.permute.xlu1 %v311_v7 }
  0x24   :  { %157 = vperm.xlu1 %285, %v58_v3   ;;  %289 = vset.pattern.permute.xlu0 %v313_v9 }
  0x28   :  { %286 = vset.pattern.permute.xlu1 %v312_v8 }
  0x29   :  { %171 = vperm.xlu1 %286, %v57_v2  }
  0x2d   :  { %288 = vset.pattern.permute.xlu1 %v313_v9 }
  0x2e   :  { %189 = vperm.xlu1 %288, %v57_v2  }
  0x32   :  { %193 = vperm.xlu1 %288, %v58_v3  }
  0x87   :  { %v82_v10 = vpop.permute.xlu1 %81  ;;  %v63_v13 = vpop.permute.xlu0 %62 }
  0x88   :  { %v92_v29 = vsub.f32 %v82_v10, %v91_v22  ;;  %v74_v30 = vsub.f32 %v63_v13, %v73_v23 }
  0x8a   :  { %v94_v36 = vmul.f32 %v92_v29, %v92_v29  ;;  %v76_v37 = vmul.f32 %v74_v30, %v74_v30 }
  0x8b   :  { %v86_v12 = vpop.permute.xlu1 %85  ;;  %v68_v18 = vpop.permute.xlu0 %67 }
  0x8c   :  { %v93_v39 = vsub.f32 %v86_v12, %v91_v22  ;;  %v75_v40 = vsub.f32 %v68_v18, %v73_v23  ;;  %v96_v46 = vadd.f32 %v94_v36, %v76_v37 }
  0x8e   :  { %v95_v50 = vmul.f32 %v93_v39, %v93_v39  ;;  %v77_v51 = vmul.f32 %v75_v40, %v75_v40 }
  0x90   :  { %v104_v15 = vpop.permute.xlu1 %103  ;;  %v100_v25 = vpop.permute.xlu0 %99  ;;  %v97_v61 = vadd.f32 %v95_v50, %v77_v51 }
  0x91   :  { %v110_v32 = vsub.f32 %v100_v25, %v109_v26  ;;  %v111_v42 = vsub.f32 %v104_v15, %v109_v26 }
  0x93   :  { %v112_v43 = vmul.f32 %v110_v32, %v110_v32  ;;  %v113_v54 = vmul.f32 %v111_v42, %v111_v42 }
  0x95   :  { %v118_v20 = vpop.permute.xlu1 %117  ;;  %v122_v38 = vpop.permute.xlu0 %121  ;;  %v114_v56 = vadd.f32 %v112_v43, %v96_v46  ;;  %v115_v5 = vadd.f32 %v113_v54, %v97_v61 }
  0x96   :  { %v128_v41 = vsub.f32 %v118_v20, %v127_v31  ;;  %v129_v53 = vsub.f32 %v122_v38, %v127_v31 }
  0x98   :  { %v130_v52 = vmul.f32 %v128_v41, %v128_v41  ;;  %v131_v63 = vmul.f32 %v129_v53, %v129_v53 }
  0x9a   :  { %v136_v28 = vpop.permute.xlu1 %135  ;;  %v154_v47 = vpop.permute.xlu0 %153  ;;  %v132_v62 = vadd.f32 %v130_v52, %v114_v56  ;;  %v133_v9 = vadd.f32 %v131_v63, %v115_v5 }
  0x9b   :  { %v146_v44 = vsub.f32 %v136_v28, %v145_v33  ;;  %v164_v58 = vsub.f32 %v154_v47, %v163_v45 }
  0x9d   :  { %v148_v57 = vmul.f32 %v146_v44, %v146_v44  ;;  %v166_v7 = vmul.f32 %v164_v58, %v164_v58 }
  0x9e   :  { %v140_v35 = vpop.permute.xlu1 %139 }
  0x9f   :  { %v147_v59 = vsub.f32 %v140_v35, %v145_v33  ;;  %v176_v2 = vpop.permute.xlu0 %175  ;;  %v150_v6 = vadd.f32 %v148_v57, %v132_v62 }
  0xa0   :  { %v183_v11 = vsub.f32 %v176_v2, %v181_v60 }
  0xa1   :  { %v149_v8 = vmul.f32 %v147_v59, %v147_v59  ;;  %v168_v14 = vadd.f32 %v166_v7, %v150_v6 }
  0xa2   :  { %v185_v18 = vmul.f32 %v183_v11, %v183_v11 }
  0xa3   :  { %v158_v48 = vpop.permute.xlu1 %157  ;;  %v151_v15 = vadd.f32 %v149_v8, %v133_v9 }
  0xa4   :  { %v165_v0 = vsub.f32 %v158_v48, %v163_v45 }
  0xa6   :  { %v167_v10 = vmul.f32 %v165_v0, %v165_v0 }
  0xa8   :  { %v172_v1 = vpop.permute.xlu1 %171  ;;  %v169_v17 = vadd.f32 %v167_v10, %v151_v15 }
  0xa9   :  { %v182_v3 = vsub.f32 %v172_v1, %v181_v60 }
  0xaa   :  { %v187_v19 = vadd.f32 %v185_v18, %v169_v17 }
  0xab   :  { %v184_v12 = vmul.f32 %v182_v3, %v182_v3 }
  0xad   :  { %v190_v13 = vpop.permute.xlu1 %189  ;;  %v186_v20 = vadd.f32 %v184_v12, %v168_v14 }
  0xae   :  { %v200_v16 = vsub.f32 %v190_v13, %v199_v4 }
  0xb0   :  { %v202_v21 = vmul.f32 %v200_v16, %v200_v16 }
  0xb1   :  { %v194_v22 = vpop.permute.xlu1 %193 }
  0xb2   :  { %v204_v23 = vadd.f32 %v202_v21, %v186_v20  ;;  %v201_v24 = vsub.f32 %v194_v22, %v199_v4 }
  0xb4   :  { %290 = vrsqrt.f32 %v204_v23  ;;  %v203_v25 = vmul.f32 %v201_v24, %v201_v24  ;;  %vm208_vm0 = vcmp.eq.f32.partialorder %v204_v23, inf  ;;  %v211_v31 = vand.u32 2147483648, %v204_v23 }
  0xb5   :  { %vm210_vm1 = vcmp.eq.f32.partialorder %v204_v23, 0.0 }
  0xb6   :  { %v205_v26 = vadd.f32 %v203_v25, %v187_v19 }
  0xb8   :  { %292 = vrsqrt.f32 %v205_v26  ;;  %vm215_vm2 = vcmp.eq.f32.partialorder %v205_v26, inf  ;;  %v218_v34 = vand.u32 2147483648, %v205_v26  ;;  %vm217_vm4 = vcmp.eq.f32.partialorder %v205_v26, 0.0 }
  0xbe   :  { %v291_v27 = vpop.eup %290 }
  0xbf   :  { %v207_v28 = vmul.f32 %v291_v27, %v204_v23 }
  0xc1   :  { %v209_v29 = vsel %vm208_vm0, %v204_v23, %v207_v28 }
  0xc2   :  { %v293_v30 = vpop.eup %292  ;;  %v212_v33 = vsel %vm210_vm1, %v211_v31, %v209_v29 }
  0xc3   :  { %v214_v32 = vmul.f32 %v293_v30, %v205_v26  ;;  %v223_v37 = vsel %vm222_vm3, %v212_v33, 0.0 }
  0xc5   :  { %v216_v35 = vsel %vm215_vm2, %v205_v26, %v214_v32 }
  0xc6   :  { %v219_v36 = vsel %vm217_vm4, %v218_v34, %v216_v35 }
  0xc7   :  { %v224_v38 = vsel %vm222_vm3, %v219_v36, 0.0 }
  0xc8   :  { %v225_v39 = vadd.f32 %v224_v38, %v223_v37 }
  0xca   :  { %226 = vadd.xlane.f32.xlu0 %v225_v39 }
 0x157   :  { %v227_v40 = vpop.xlane.xlu0 %226 }
 0x158   :  { %v228_v41 = vrot.slane %v227_v40, 4 }
 0x15a   :  { %v229_v42 = vadd.f32 %v228_v41, %v227_v40 }
 0x15c   :  { %v230_v43 = vrot.slane %v229_v42, 2 }
 0x15e   :  { %v231_v44 = vadd.f32 %v230_v43, %v229_v42 }
 0x160   :  { %v232_v45 = vrot.slane %v231_v44, 1 }
 0x162   :  { %v233_v46 = vadd.f32 %v232_v45, %v231_v44 }
 0x164   :  { %266 = vpush %v233_v46 }
 0x195   :  { %s267_s8 = spop %266 }
 0x196   :  { %s235_s9 = smul.f32 %s267_s8, %s221_s7 }
 0x198   :  { %237 = sst [smem:[#allocation5]] %s235_s9 }
 0x199   :  { %303 = shalt.err (!%p300_p5)
}
 0x19a   :  { %s314_s17 = smov [#allocation5]  }
 0x19b   :  { %245 = dma.smem_to_hbm %s314_s17, 16, %s377_s4, [#allocation6]  }
 0x19c   :  { %304 = dma.done.wait [#allocation6], 16  }
 0x19d   :  { %305 = vsyncadd [#allocation6], 4294967280 }
 0x19e   :  { %249 = sfence }
 0x19f   :  { %250 = vsyncpa [#allocation6], 1 }

</bundles_post_ra>
